<compile_context>
chip_gen: v7x
topology: tpu7x:2x2x1
jax: 0.10.0
libtpu: 0.0.40
codegen_flags: <defaults>
</compile_context>

<pallas_src>
import jax
import jax.numpy as jnp
from jax.experimental import pallas as pl
from jax.experimental.pallas import tpu as pltpu


def _cdiv(a, b):
    return -(-a // b)


def _round_up(x, m):
    return (x + m - 1) // m * m


def _chip_config():
    """Per-generation tuning: (num_splits across TensorCores, VMEM request cap)."""
    try:
        kind = jax.devices()[0].device_kind.lower()
    except Exception:
        kind = ""
    if "v7" in kind:                    # 2 TCs/chip, only 64 MiB VMEM per TC
        return 2, 48 << 20
    if "v5" in kind or "v6" in kind:    # single TC, 128 MiB VMEM
        return 1, 100 << 20
    return 1, 48 << 20                  # unknown chip: conservative caps


def _choose_2d_view(shape, n):
    """Pick an (R, C) view reachable from the input by a copy-free reshape."""
    if n % 2048 == 0 and n >= 8 * 2048:
        return n // 2048, 2048                       # big lane-dense rows
    if len(shape) >= 2:
        r = 1
        for d in shape[:-1]:
            r *= int(d)
        return r, int(shape[-1])                     # natural trailing-dim layout
    for c in (1024, 512, 256, 128):
        if n % c == 0:
            return n // c, c
    return 1, n                                      # last resort (tiny/odd 1-D)


@jax.jit
def masked_mse_loss(pred, target, mask):
    assert pred.shape == target.shape == mask.shape
    n = pred.size
    R, C = _choose_2d_view(pred.shape, n)

    # Copy-free views (row-major reshape lowers to a bitcast under jit).
    pred2d = pred.reshape(R, C)
    target2d = target.reshape(R, C)
    mask2d = mask.reshape(R, C)

    num_splits, vmem_cap = _chip_config()

    # ---------------- tiling --------------------------------------------------
    col_tile = C if C <= 2048 else 2048                      # mult of 128 or == C
    target_elems = (4 << 20) // 4                            # ~4 MiB of f32 / block
    row_cfg = max(32, min(512, (target_elems // max(col_tile, 1)) // 32 * 32))
    row_tile = min(row_cfg, _round_up(R, 32))                # mult of 32 (bf16/int8 packing)

    total_row_blocks = _cdiv(R, row_tile)
    num_splits = max(1, min(num_splits, total_row_blocks))
    num_r = _cdiv(total_row_blocks, num_splits)
    num_cb = _cdiv(C, col_tile)

    # Do phantom/partial blocks exist along rows/cols? (static, trace-time)
    ragged_rows = (num_splits * num_r * row_tile) != R
    ragged_cols = (num_cb * col_tile) != C
    groups = row_tile // 8

    # ---------------- kernel --------------------------------------------------
    def kernel(pred_ref, target_ref, mask_ref, out_ref, acc_sq, acc_m):
        s = pl.program_id(0)
        r = pl.program_id(1)
        c = pl.program_id(2)

        @pl.when((r == 0) & (c == 0))
        def _():
            acc_sq[...] = jnp.zeros_like(acc_sq)
            acc_m[...] = jnp.zeros_like(acc_m)

        # Unclamped offsets of this block.  The index_map clamps the DMA so it
        # stays in bounds; phantom / ragged regions are zeroed here instead.
        row_off = (s * num_r + r) * row_tile
        col_off = c * col_tile

        col_ok = None
        if ragged_cols:
            col_ids = jax.lax.broadcasted_iota(jnp.int32, (8, col_tile), 1) + col_off
            col_ok = col_ids < C

        # In-register partial sums: one small VMEM RMW per grid step (not per group).
        d2_acc = jnp.zeros((8, col_tile), jnp.float32)
        m_acc = jnp.zeros((8, col_tile), jnp.float32)
        for g in range(groups):                      # unrolled pure-VPU streaming loop
            sl = pl.ds(g * 8, 8)
            p = pred_ref[sl, :].astype(jnp.float32)
            t = target_ref[sl, :].astype(jnp.float32)
            m = mask_ref[sl, :].astype(jnp.float32)
            diff = p * m - t                         # target NOT masked (matches module)
            d2 = diff * diff
            if ragged_rows or ragged_cols:
                inb = col_ok
                if ragged_rows:
                    row_ids = (jax.lax.broadcasted_iota(jnp.int32, (8, col_tile), 0)
                               + (row_off + g * 8))
                    row_ok = row_ids < R
                    inb = row_ok if inb is None else (inb & row_ok)
                # Select, not multiply: stale-VMEM NaN/Inf garbage must not propagate.
                d2 = jnp.where(inb, d2, 0.0)
                m = jnp.where(inb, m, 0.0)
            d2_acc = d2_acc + d2
            m_acc = m_acc + m

        acc_sq[...] += d2_acc
        acc_m[...] += m_acc

        @pl.when((r == pl.num_programs(1) - 1) & (c == pl.num_programs(2) - 1))
        def _():
            # One-time cross-lane/sublane reduce per split, only on the final step.
            out_ref[0, 0] = jnp.sum(acc_sq[...])
            out_ref[0, 1] = jnp.sum(acc_m[...])

    # ---------------- specs ---------------------------------------------------
    def in_map(s_, r_, c_):
        # Clamp so the DMA never points past the array; the kernel masks the
        # corresponding phantom rows to zero using the *unclamped* offset.
        rb = jnp.minimum(s_ * num_r + r_, total_row_blocks - 1)
        return (rb, c_)

    in_spec = pl.BlockSpec((row_tile, col_tile), in_map)

    block_elems = row_tile * col_tile
    in_bytes = 2 * block_elems * (pred2d.dtype.itemsize
                                  + target2d.dtype.itemsize
                                  + mask2d.dtype.itemsize)
    acc_bytes = 2 * 8 * col_tile * 4
    vmem_limit = int(min(vmem_cap, in_bytes + acc_bytes + (8 << 20)))

    total_in_bytes = n * (pred.dtype.itemsize + target.dtype.itemsize
                          + mask.dtype.itemsize)

    partials = pl.pallas_call(
        kernel,
        out_shape=jax.ShapeDtypeStruct((num_splits, 2), jnp.float32),
        grid_spec=pltpu.PrefetchScalarGridSpec(
            num_scalar_prefetch=0,
            grid=(num_splits, num_r, num_cb),
            in_specs=[in_spec, in_spec, in_spec],
            out_specs=pl.BlockSpec((1, 2), lambda s_, r_, c_: (s_, 0),
                                   memory_space=pltpu.SMEM),
            scratch_shapes=[pltpu.VMEM((8, col_tile), jnp.float32),
                            pltpu.VMEM((8, col_tile), jnp.float32)],
        ),
        compiler_params=pltpu.CompilerParams(
            dimension_semantics=("parallel", "arbitrary", "arbitrary"),
            vmem_limit_bytes=vmem_limit,
        ),
        cost_estimate=pl.CostEstimate(
            flops=5 * n,
            transcendentals=0,
            bytes_accessed=total_in_bytes,
        ),
    )(pred2d, target2d, mask2d)

    sse = jnp.sum(partials[:, 0])
    mask_sum = jnp.sum(partials[:, 1])
    # mask.sum() == 0 -> inf/nan, exactly like the PyTorch module.
    return sse / mask_sum


if __name__ == "__main__":
    key = jax.random.PRNGKey(0)
    k1, k2, k3 = jax.random.split(key, 3)

    batch, seq_len = 4, 256  # small shapes consistent with the module (batch, seq_len)
    pred = jax.random.normal(k1, (batch, seq_len), dtype=jnp.float32)
    target = jax.random.normal(k2, (batch, seq_len), dtype=jnp.float32)
    # Narrow-dtype mask per the caller contract (int8 / bool / bf16 all supported).
    mask = (jax.random.uniform(k3, (batch, seq_len)) > 0.5).astype(jnp.int8)

    loss = masked_mse_loss(pred, target, mask)
    loss = jax.block_until_ready(loss)

    # Pure-JAX reference (== PyTorch MSELoss(reduction='sum')(pred*mask, target)/mask.sum()).
    mask_f = mask.astype(jnp.float32)
    ref = jnp.sum((pred * mask_f - target) ** 2) / jnp.sum(mask_f)
    assert jnp.allclose(loss, ref, rtol=1e-5, atol=1e-5), (loss, ref)

    print("KERNEL_OK")
</pallas_src>

<mosaic_0001>
module attributes {stable_mosaic.version = 11 : i64} {
  func.func @kernel(%arg0: i32, %arg1: i32, %arg2: i32, %arg3: memref<32x256xf32, #tpu.memory_space<vmem>>, %arg4: memref<32x256xf32, #tpu.memory_space<vmem>>, %arg5: memref<32x256xi8, #tpu.memory_space<vmem>>, %arg6: memref<1x2xf32, #tpu.memory_space<smem>>, %arg7: memref<8x256xf32, #tpu.memory_space<vmem>>, %arg8: memref<8x256xf32, #tpu.memory_space<vmem>>) attributes {dimension_semantics = [#tpu.dimension_semantics<parallel>, #tpu.dimension_semantics<arbitrary>, #tpu.dimension_semantics<arbitrary>], iteration_bounds = array<i64: 1, 1, 1>, scalar_prefetch = 0 : i64, scratch_operands = 2 : i64, tpu.core_type = #tpu.core_type<tc>, window_params = [{transform_indices = @transform_0, window_bounds = array<i64: 32, 256>}, {transform_indices = @transform_1, window_bounds = array<i64: 32, 256>}, {transform_indices = @transform_2, window_bounds = array<i64: 32, 256>}, {transform_indices = @transform_3, window_bounds = array<i64: 1, 2>}]} {
    %c0_i32 = arith.constant 0 : i32
    %0 = arith.cmpi eq, %arg1, %c0_i32 : i32
    %c0_i32_0 = arith.constant 0 : i32
    %1 = arith.cmpi eq, %arg2, %c0_i32_0 : i32
    %2 = arith.andi %0, %1 : i1
    %3 = arith.extui %2 : i1 to i32
    %c0_i32_1 = arith.constant 0 : i32
    %4 = arith.cmpi ne, %3, %c0_i32_1 : i32
    scf.if %4 {
      %cst_46 = arith.constant 0.000000e+00 : f32
      %97 = vector.broadcast %cst_46 : f32 to vector<8x256xf32>
      %c0_47 = arith.constant 0 : index
      %c0_48 = arith.constant 0 : index
      %98 = vector.load %arg7[%c0_47, %c0_48] : memref<8x256xf32, #tpu.memory_space<vmem>>, vector<8x256xf32>
      tpu.vector_store %arg7[%c0_47, %c0_48], %97 {strides = array<i32>} : memref<8x256xf32, #tpu.memory_space<vmem>>, vector<8x256xf32>,
      %cst_49 = arith.constant 0.000000e+00 : f32
      %99 = vector.broadcast %cst_49 : f32 to vector<8x256xf32>
      %c0_50 = arith.constant 0 : index
      %c0_51 = arith.constant 0 : index
      %100 = vector.load %arg8[%c0_50, %c0_51] : memref<8x256xf32, #tpu.memory_space<vmem>>, vector<8x256xf32>
      tpu.vector_store %arg8[%c0_50, %c0_51], %99 {strides = array<i32>} : memref<8x256xf32, #tpu.memory_space<vmem>>, vector<8x256xf32>,
    } else {
    }
    %c1_i32 = arith.constant 1 : i32
    %5 = arith.muli %arg0, %c1_i32 : i32
    %6 = arith.addi %5, %arg1 : i32
    %c32_i32 = arith.constant 32 : i32
    %7 = arith.muli %6, %c32_i32 : i32
    %cst = arith.constant 0.000000e+00 : f32
    %8 = vector.broadcast %cst : f32 to vector<8x256xf32>
    %cst_2 = arith.constant 0.000000e+00 : f32
    %9 = vector.broadcast %cst_2 : f32 to vector<8x256xf32>
    %c0 = arith.constant 0 : index
    %c0_3 = arith.constant 0 : index
    %10 = vector.load %arg3[%c0, %c0_3] : memref<32x256xf32, #tpu.memory_space<vmem>>, vector<8x256xf32>
    %c0_4 = arith.constant 0 : index
    %c0_5 = arith.constant 0 : index
    %11 = vector.load %arg4[%c0_4, %c0_5] : memref<32x256xf32, #tpu.memory_space<vmem>>, vector<8x256xf32>
    %c0_6 = arith.constant 0 : index
    %c0_7 = arith.constant 0 : index
    %12 = vector.load %arg5[%c0_6, %c0_7] : memref<32x256xi8, #tpu.memory_space<vmem>>, vector<8x256xi8>
    %13 = arith.sitofp %12 : vector<8x256xi8> to vector<8x256xf32>
    %14 = arith.mulf %10, %13 : vector<8x256xf32>
    %15 = arith.subf %14, %11 : vector<8x256xf32>
    %16 = arith.mulf %15, %15 : vector<8x256xf32>
    %17 = tpu.iota {dimensions = array<i32: 0>} : vector<8x256xi32>
    %c0_i32_8 = arith.constant 0 : i32
    %18 = arith.addi %7, %c0_i32_8 : i32
    %19 = vector.broadcast %18 : i32 to vector<8x256xi32>
    %20 = arith.addi %17, %19 : vector<8x256xi32>
    %c4_i32 = arith.constant 4 : i32
    %21 = vector.broadcast %c4_i32 : i32 to vector<8x256xi32>
    %22 = arith.cmpi slt, %20, %21 : vector<8x256xi32>
    %cst_9 = arith.constant 0.000000e+00 : f32
    %23 = vector.broadcast %cst_9 : f32 to vector<8x256xf32>
    %24 = arith.select %22, %16, %23 : vector<8x256xi1>, vector<8x256xf32>
    %cst_10 = arith.constant 0.000000e+00 : f32
    %25 = vector.broadcast %cst_10 : f32 to vector<8x256xf32>
    %26 = arith.select %22, %13, %25 : vector<8x256xi1>, vector<8x256xf32>
    %27 = arith.addf %8, %24 : vector<8x256xf32>
    %28 = arith.addf %9, %26 : vector<8x256xf32>
    %c8 = arith.constant 8 : index
    %c0_11 = arith.constant 0 : index
    %29 = vector.load %arg3[%c8, %c0_11] : memref<32x256xf32, #tpu.memory_space<vmem>>, vector<8x256xf32>
    %c8_12 = arith.constant 8 : index
    %c0_13 = arith.constant 0 : index
    %30 = vector.load %arg4[%c8_12, %c0_13] : memref<32x256xf32, #tpu.memory_space<vmem>>, vector<8x256xf32>
    %c8_14 = arith.constant 8 : index
    %c0_15 = arith.constant 0 : index
    %31 = vector.load %arg5[%c8_14, %c0_15] : memref<32x256xi8, #tpu.memory_space<vmem>>, vector<8x256xi8>
    %32 = arith.sitofp %31 : vector<8x256xi8> to vector<8x256xf32>
    %33 = arith.mulf %29, %32 : vector<8x256xf32>
    %34 = arith.subf %33, %30 : vector<8x256xf32>
    %35 = arith.mulf %34, %34 : vector<8x256xf32>
    %36 = tpu.iota {dimensions = array<i32: 0>} : vector<8x256xi32>
    %c8_i32 = arith.constant 8 : i32
    %37 = arith.addi %7, %c8_i32 : i32
    %38 = vector.broadcast %37 : i32 to vector<8x256xi32>
    %39 = arith.addi %36, %38 : vector<8x256xi32>
    %c4_i32_16 = arith.constant 4 : i32
    %40 = vector.broadcast %c4_i32_16 : i32 to vector<8x256xi32>
    %41 = arith.cmpi slt, %39, %40 : vector<8x256xi32>
    %cst_17 = arith.constant 0.000000e+00 : f32
    %42 = vector.broadcast %cst_17 : f32 to vector<8x256xf32>
    %43 = arith.select %41, %35, %42 : vector<8x256xi1>, vector<8x256xf32>
    %cst_18 = arith.constant 0.000000e+00 : f32
    %44 = vector.broadcast %cst_18 : f32 to vector<8x256xf32>
    %45 = arith.select %41, %32, %44 : vector<8x256xi1>, vector<8x256xf32>
    %46 = arith.addf %27, %43 : vector<8x256xf32>
    %47 = arith.addf %28, %45 : vector<8x256xf32>
    %c16 = arith.constant 16 : index
    %c0_19 = arith.constant 0 : index
    %48 = vector.load %arg3[%c16, %c0_19] : memref<32x256xf32, #tpu.memory_space<vmem>>, vector<8x256xf32>
    %c16_20 = arith.constant 16 : index
    %c0_21 = arith.constant 0 : index
    %49 = vector.load %arg4[%c16_20, %c0_21] : memref<32x256xf32, #tpu.memory_space<vmem>>, vector<8x256xf32>
    %c16_22 = arith.constant 16 : index
    %c0_23 = arith.constant 0 : index
    %50 = vector.load %arg5[%c16_22, %c0_23] : memref<32x256xi8, #tpu.memory_space<vmem>>, vector<8x256xi8>
    %51 = arith.sitofp %50 : vector<8x256xi8> to vector<8x256xf32>
    %52 = arith.mulf %48, %51 : vector<8x256xf32>
    %53 = arith.subf %52, %49 : vector<8x256xf32>
    %54 = arith.mulf %53, %53 : vector<8x256xf32>
    %55 = tpu.iota {dimensions = array<i32: 0>} : vector<8x256xi32>
    %c16_i32 = arith.constant 16 : i32
    %56 = arith.addi %7, %c16_i32 : i32
    %57 = vector.broadcast %56 : i32 to vector<8x256xi32>
    %58 = arith.addi %55, %57 : vector<8x256xi32>
    %c4_i32_24 = arith.constant 4 : i32
    %59 = vector.broadcast %c4_i32_24 : i32 to vector<8x256xi32>
    %60 = arith.cmpi slt, %58, %59 : vector<8x256xi32>
    %cst_25 = arith.constant 0.000000e+00 : f32
    %61 = vector.broadcast %cst_25 : f32 to vector<8x256xf32>
    %62 = arith.select %60, %54, %61 : vector<8x256xi1>, vector<8x256xf32>
    %cst_26 = arith.constant 0.000000e+00 : f32
    %63 = vector.broadcast %cst_26 : f32 to vector<8x256xf32>
    %64 = arith.select %60, %51, %63 : vector<8x256xi1>, vector<8x256xf32>
    %65 = arith.addf %46, %62 : vector<8x256xf32>
    %66 = arith.addf %47, %64 : vector<8x256xf32>
    %c24 = arith.constant 24 : index
    %c0_27 = arith.constant 0 : index
    %67 = vector.load %arg3[%c24, %c0_27] : memref<32x256xf32, #tpu.memory_space<vmem>>, vector<8x256xf32>
    %c24_28 = arith.constant 24 : index
    %c0_29 = arith.constant 0 : index
    %68 = vector.load %arg4[%c24_28, %c0_29] : memref<32x256xf32, #tpu.memory_space<vmem>>, vector<8x256xf32>
    %c24_30 = arith.constant 24 : index
    %c0_31 = arith.constant 0 : index
    %69 = vector.load %arg5[%c24_30, %c0_31] : memref<32x256xi8, #tpu.memory_space<vmem>>, vector<8x256xi8>
    %70 = arith.sitofp %69 : vector<8x256xi8> to vector<8x256xf32>
    %71 = arith.mulf %67, %70 : vector<8x256xf32>
    %72 = arith.subf %71, %68 : vector<8x256xf32>
    %73 = arith.mulf %72, %72 : vector<8x256xf32>
    %74 = tpu.iota {dimensions = array<i32: 0>} : vector<8x256xi32>
    %c24_i32 = arith.constant 24 : i32
    %75 = arith.addi %7, %c24_i32 : i32
    %76 = vector.broadcast %75 : i32 to vector<8x256xi32>
    %77 = arith.addi %74, %76 : vector<8x256xi32>
    %c4_i32_32 = arith.constant 4 : i32
    %78 = vector.broadcast %c4_i32_32 : i32 to vector<8x256xi32>
    %79 = arith.cmpi slt, %77, %78 : vector<8x256xi32>
    %cst_33 = arith.constant 0.000000e+00 : f32
    %80 = vector.broadcast %cst_33 : f32 to vector<8x256xf32>
    %81 = arith.select %79, %73, %80 : vector<8x256xi1>, vector<8x256xf32>
    %cst_34 = arith.constant 0.000000e+00 : f32
    %82 = vector.broadcast %cst_34 : f32 to vector<8x256xf32>
    %83 = arith.select %79, %70, %82 : vector<8x256xi1>, vector<8x256xf32>
    %84 = arith.addf %65, %81 : vector<8x256xf32>
    %85 = arith.addf %66, %83 : vector<8x256xf32>
    %c0_35 = arith.constant 0 : index
    %c0_36 = arith.constant 0 : index
    %86 = vector.load %arg7[%c0_35, %c0_36] : memref<8x256xf32, #tpu.memory_space<vmem>>, vector<8x256xf32>
    %87 = arith.addf %86, %84 : vector<8x256xf32>
    %c0_37 = arith.constant 0 : index
    %c0_38 = arith.constant 0 : index
    %88 = vector.load %arg7[%c0_37, %c0_38] : memref<8x256xf32, #tpu.memory_space<vmem>>, vector<8x256xf32>
    tpu.vector_store %arg7[%c0_37, %c0_38], %87 {strides = array<i32>} : memref<8x256xf32, #tpu.memory_space<vmem>>, vector<8x256xf32>,
    %c0_39 = arith.constant 0 : index
    %c0_40 = arith.constant 0 : index
    %89 = vector.load %arg8[%c0_39, %c0_40] : memref<8x256xf32, #tpu.memory_space<vmem>>, vector<8x256xf32>
    %90 = arith.addf %89, %85 : vector<8x256xf32>
    %c0_41 = arith.constant 0 : index
    %c0_42 = arith.constant 0 : index
    %91 = vector.load %arg8[%c0_41, %c0_42] : memref<8x256xf32, #tpu.memory_space<vmem>>, vector<8x256xf32>
    tpu.vector_store %arg8[%c0_41, %c0_42], %90 {strides = array<i32>} : memref<8x256xf32, #tpu.memory_space<vmem>>, vector<8x256xf32>,
    %c0_i32_43 = arith.constant 0 : i32
    %92 = arith.cmpi eq, %arg1, %c0_i32_43 : i32
    %c0_i32_44 = arith.constant 0 : i32
    %93 = arith.cmpi eq, %arg2, %c0_i32_44 : i32
    %94 = arith.andi %92, %93 : i1
    %95 = arith.extui %94 : i1 to i32
    %c0_i32_45 = arith.constant 0 : i32
    %96 = arith.cmpi ne, %95, %c0_i32_45 : i32
    scf.if %96 {
      %c0_46 = arith.constant 0 : index
      %c0_47 = arith.constant 0 : index
      %97 = vector.load %arg7[%c0_46, %c0_47] : memref<8x256xf32, #tpu.memory_space<vmem>>, vector<8x256xf32>
      %98 = vector.shape_cast %97 : vector<8x256xf32> to vector<1x8x256xf32>
      %cst_48 = arith.constant dense<0.000000e+00> : vector<1xf32>
      %99 = vector.multi_reduction <add>, %98, %cst_48 [1, 2] : vector<1x8x256xf32> to vector<1xf32>
      %100 = vector.shape_cast %99 : vector<1xf32> to vector<1x1x1xf32>
      %101 = vector.extract %100[0, 0, 0] : f32 from vector<1x1x1xf32>
      %c0_49 = arith.constant 0 : index
      %c0_50 = arith.constant 0 : index
      %102 = memref.load %arg6[%c0_49, %c0_50] : memref<1x2xf32, #tpu.memory_space<smem>>
      memref.store %101, %arg6[%c0_49, %c0_50] : memref<1x2xf32, #tpu.memory_space<smem>>
      %c0_51 = arith.constant 0 : index
      %c0_52 = arith.constant 0 : index
      %103 = vector.load %arg8[%c0_51, %c0_52] : memref<8x256xf32, #tpu.memory_space<vmem>>, vector<8x256xf32>
      %104 = vector.shape_cast %103 : vector<8x256xf32> to vector<1x8x256xf32>
      %cst_53 = arith.constant dense<0.000000e+00> : vector<1xf32>
      %105 = vector.multi_reduction <add>, %104, %cst_53 [1, 2] : vector<1x8x256xf32> to vector<1xf32>
      %106 = vector.shape_cast %105 : vector<1xf32> to vector<1x1x1xf32>
      %107 = vector.extract %106[0, 0, 0] : f32 from vector<1x1x1xf32>
      %c0_54 = arith.constant 0 : index
      %c1 = arith.constant 1 : index
      %108 = memref.load %arg6[%c0_54, %c1] : memref<1x2xf32, #tpu.memory_space<smem>>
      memref.store %107, %arg6[%c0_54, %c1] : memref<1x2xf32, #tpu.memory_space<smem>>
    } else {
    }
    return
  }
  func.func @transform_0(%arg0: i32, %arg1: i32, %arg2: i32) -> (i32, i32) {
    %c1_i32 = arith.constant 1 : i32
    %0 = arith.muli %arg0, %c1_i32 : i32
    %1 = arith.addi %0, %arg1 : i32
    %c0_i32 = arith.constant 0 : i32
    %2 = arith.minsi %1, %c0_i32 : i32
    %c0_i32_0 = arith.constant 0 : i32
    return %2, %arg2 : i32, i32
  }
  func.func @transform_1(%arg0: i32, %arg1: i32, %arg2: i32) -> (i32, i32) {
    %c1_i32 = arith.constant 1 : i32
    %0 = arith.muli %arg0, %c1_i32 : i32
    %1 = arith.addi %0, %arg1 : i32
    %c0_i32 = arith.constant 0 : i32
    %2 = arith.minsi %1, %c0_i32 : i32
    %c0_i32_0 = arith.constant 0 : i32
    return %2, %arg2 : i32, i32
  }
  func.func @transform_2(%arg0: i32, %arg1: i32, %arg2: i32) -> (i32, i32) {
    %c1_i32 = arith.constant 1 : i32
    %0 = arith.muli %arg0, %c1_i32 : i32
    %1 = arith.addi %0, %arg1 : i32
    %c0_i32 = arith.constant 0 : i32
    %2 = arith.minsi %1, %c0_i32 : i32
    %c0_i32_0 = arith.constant 0 : i32
    return %2, %arg2 : i32, i32
  }
  func.func @transform_3(%arg0: i32, %arg1: i32, %arg2: i32) -> (i32, i32) {
    %c0_i32 = arith.constant 0 : i32
    %c0_i32_0 = arith.constant 0 : i32
    return %arg0, %c0_i32 : i32, i32
  }
}

</mosaic_0001>

<bundles_post_ra>
// kernel: masked_mse_loss.1
= control target key start
LH: loop header
LB: loop body
LE: loop exit
PB: predicated region body
PF: predicated region fallthrough
CT: control target
= control target key end

     0   :  { %8 = vsyncpa [#allocation5], 0  ;;  %s500_s0 = inlined_call_operand.hbm [shape: f32[4,256], index: 0, kind: input, shape index: {}]   ;;  %s501_s1 = inlined_call_operand.hbm [shape: f32[4,256], index: 1, kind: input, shape index: {}]   ;;  %s502_s2 = inlined_call_operand.vmem [shape: s8[4,256], index: 2, kind: input, shape index: {}]   ;;  %s503_s3 = inlined_call_operand.vmem [shape: f32[1,2], index: 3, kind: output, shape index: {}]  }
   0x1   :  { %9 = vsyncpa [#allocation8], 0 }
   0x2   :  { %10 = vsyncpa [#allocation6], 0 }
   0x3   :  { %22 = vsyncadd [#allocation5], 896  ;;  %s445_s12 = smov [#allocation4]   ;;  %s383_s16 = scalar_lea.hbm %s500_s0, 128 }
   0x4   :  { %s28_s13 = sshll.u32 %s445_s12, 4  ;;  %p384_p0 = scmp.ne.s32.totalorder %s500_s0, %s383_s16  ;;  %s29_s13 = int_to_ptr.vmem [resolvable:$true] %s28_s13 }
   0x5   :  { %p387_p1 = scmp.lt.u32.totalorder %s383_s16, %s500_s0 }
   0x7   :  { %p389_p2 = pnand %p387_p1, %p384_p0 }
   0x9   :  { %392 = shalt.err (!%p389_p2)
}
   0xa   :  { %s393_s21 = scalar_lea.vmem %s29_s13, 128  ;;  %s397_s22 = scalar_lea.vmem %s29_s13, 1024 }
   0xb   :  { %p394_p3 = scmp.ne.s32.totalorder %s29_s13, %s393_s21  ;;  %p398_p4 = scmp.lt.s32.totalorder %s29_s13, %s29_s13 }
   0xc   :  { %p399_p5 = scmp.lt.s32.totalorder %s397_s22, %s393_s21 }
   0xe   :  { %p400_p6 = por %p399_p5, %p398_p4 }
  0x10   :  { %p401_p7 = pnand %p400_p6, %p394_p3 }
  0x12   :  { %404 = shalt.err (!%p401_p7)
}
  0x13   :  { %s446_s23 = smov 128   ;;  %s447_s24 = smov 8  }
  0x14   :  { %34 = dma.hbm_to_vmem [thread:$0]  %s500_s0, 128, %s29_s13, [#allocation5], %s446_s23, %s446_s23, %s447_s24  }
  0x15   :  { %46 = vsyncadd [#allocation8], 896  ;;  %s448_s27 = smov [#allocation7]   ;;  %s405_s4 = scalar_lea.hbm %s501_s1, 128 }
  0x16   :  { %s52_s28 = sshll.u32 %s448_s27, 4  ;;  %p406_p8 = scmp.ne.s32.totalorder %s501_s1, %s405_s4  ;;  %s53_s28 = int_to_ptr.vmem [resolvable:$true] %s52_s28 }
  0x17   :  { %p409_p9 = scmp.lt.u32.totalorder %s405_s4, %s501_s1 }
  0x19   :  { %p411_p10 = pnand %p409_p9, %p406_p8 }
  0x1b   :  { %414 = shalt.err (!%p411_p10)
}
  0x1c   :  { %s415_s9 = scalar_lea.vmem %s53_s28, 128  ;;  %s419_s0 = scalar_lea.vmem %s53_s28, 1024 }
  0x1d   :  { %p416_p11 = scmp.ne.s32.totalorder %s53_s28, %s415_s9  ;;  %p420_p12 = scmp.lt.s32.totalorder %s53_s28, %s53_s28 }
  0x1e   :  { %p421_p13 = scmp.lt.s32.totalorder %s419_s0, %s415_s9 }
  0x20   :  { %p422_p0 = por %p421_p13, %p420_p12 }
  0x22   :  { %p423_p1 = pnand %p422_p0, %p416_p11 }
  0x24   :  { %426 = shalt.err (!%p423_p1)
}
  0x25   :  { %58 = dma.hbm_to_vmem [thread:$0]  %s501_s1, 128, %s53_s28, [#allocation8], %s446_s23, %s446_s23, %s447_s24  }
  0x26   :  { %439 = dma.done.wait [#allocation5], 1024  }
  0x27   :  { %440 = vsyncadd [#allocation5], 4294966272 }
  0x28   :  { %441 = dma.done.wait [#allocation8], 1024  }
  0x29   :  { %442 = vsyncadd [#allocation8], 4294966272  ;;  %v371_v0 = vld [vmem:[%s502_s2] sm:$0xf]   ;;  %v141_v4 = vld [vmem:[#allocation4 + $0x8] sm:$0xff]  ;;  %v156_v5 = vlaneseq  ;;  %s349_s15 = sshll.u32 %s503_s3, 4  ;;  %s350_s15 = int_to_ptr.vmem [resolvable:$true] %s349_s15 }
  0x2a   :  { %v372_v1 = vunpack.c.0.s8 %v371_v0  ;;  %v373_v2 = vunpack.c.1.s8 %v371_v0  ;;  %v140_v3 = vld [vmem:[#allocation4] sm:$0xff]  ;;  %v143_v9 = vld [vmem:[#allocation7 + $0x8] sm:$0xff]  ;;  %s427_s17 = scalar_lea.vmem %s350_s15, 16  ;;  %p432_p3 = scmp.lt.s32.totalorder %s350_s15, %s350_s15 }
  0x2b   :  { %v142_v8 = vld [vmem:[#allocation7] sm:$0xff]  ;;  %v157_v12 = vshrl.u32 %v156_v5, 7  ;;  %p428_p2 = scmp.ne.s32.totalorder %s350_s15, %s427_s17  ;;  %p433_p4 = scmp.lt.s32.totalorder %s427_s17, %s427_s17 }
  0x2c   :  { %v148_v6 = vcvt.s32.f32 %v372_v1  ;;  %v149_v7 = vcvt.s32.f32 %v373_v2 }
  0x2d   :  { %vm160_vm0 = vcmp.lt.s32.totalorder %v157_v12, 4  ;;  %p434_p5 = por %p433_p4, %p432_p3 }
  0x2e   :  { %v150_v10 = vmul.f32 %v148_v6, %v140_v3  ;;  %v151_v11 = vmul.f32 %v149_v7, %v141_v4  ;;  %v171_v17 = vcombine.low %v148_v6, %v149_v7  ;;  %v172_v18 = vcombine.high %v148_v6, %v149_v7 }
  0x2f   :  { %p435_p6 = pnand %p434_p5, %p428_p2 }
  0x30   :  { %v152_v13 = vsub.f32 %v150_v10, %v142_v8  ;;  %v153_v14 = vsub.f32 %v151_v11, %v143_v9  ;;  %v175_v23 = vsel %vm160_vm0, %v171_v17, 0.0  ;;  %v176_v24 = vsel %vm160_vm0, %v172_v18, 0.0 }
  0x31   :  { %v331_v26 = vadd.f32 %v176_v24, %v175_v23 }
  0x32   :  { %v154_v15 = vmul.f32 %v152_v13, %v152_v13  ;;  %v155_v16 = vmul.f32 %v153_v14, %v153_v14 }
  0x34   :  { %v163_v19 = vcombine.low %v154_v15, %v155_v16  ;;  %v164_v20 = vcombine.high %v154_v15, %v155_v16 }
  0x36   :  { %v167_v21 = vsel %vm160_vm0, %v163_v19, 0.0  ;;  %v168_v22 = vsel %vm160_vm0, %v164_v20, 0.0 }
  0x37   :  { %v317_v25 = vadd.f32 %v168_v22, %v167_v21 }
  0x39   :  { %318 = vadd.xlane.f32.xlu0 %v317_v25 }
  0x3d   :  { %332 = vadd.xlane.f32.xlu0 %v331_v26 }
  0xc6   :  { %v319_v27 = vpop.xlane.xlu0 %318 }
  0xc7   :  { %v320_v28 = vrot.slane %v319_v27, 4 }
  0xc9   :  { %v321_v29 = vadd.f32 %v320_v28, %v319_v27 }
  0xca   :  { %v333_v30 = vpop.xlane.xlu0 %332 }
  0xcb   :  { %v322_v31 = vrot.slane %v321_v29, 2  ;;  %v334_v32 = vrot.slane %v333_v30, 4 }
  0xcd   :  { %v335_v33 = vadd.f32 %v334_v32, %v333_v30  ;;  %v323_v34 = vadd.f32 %v322_v31, %v321_v29 }
  0xcf   :  { %v336_v35 = vrot.slane %v335_v33, 2  ;;  %v324_v36 = vrot.slane %v323_v34, 1 }
  0xd1   :  { %v337_v37 = vadd.f32 %v336_v35, %v335_v33  ;;  %v325_v38 = vadd.f32 %v324_v36, %v323_v34 }
  0xd3   :  { %374 = vpush %v325_v38  ;;  %v338_v39 = vrot.slane %v337_v37, 1 }
  0xd5   :  { %v339_v40 = vadd.f32 %v338_v39, %v337_v37 }
  0xd7   :  { %376 = vpush %v339_v40 }
 0x104   :  { %s375_s1 = spop %374 }
 0x105   :  { %328 = sst [smem:[#allocation9]] %s375_s1 }
 0x108   :  { %s377_s16 = spop %376 }
 0x109   :  { %342 = sst [smem:[#allocation9 + $0x1]] %s377_s16 }
 0x10a   :  { %438 = shalt.err (!%p435_p6)
}
 0x10b   :  { %s449_s18 = smov [#allocation9]  }
 0x10c   :  { %352 = dma.smem_to_vmem %s449_s18, 16, %s350_s15, [#allocation6]  }
 0x10d   :  { %443 = dma.done.wait [#allocation6], 16  }
 0x10e   :  { %444 = vsyncadd [#allocation6], 4294967280 }
 0x10f   :  { %356 = sfence }
 0x110   :  { %357 = vsyncpa [#allocation5], 1 }
 0x111   :  { %358 = vsyncpa [#allocation8], 1 }
 0x112   :  { %359 = vsyncpa [#allocation6], 1 }

</bundles_post_ra>
